<compile_context>
chip_gen: v5e
topology: v5e:2x2
jax: 0.10.0
libtpu: 0.0.40
codegen_flags: <defaults>
</compile_context>

<pallas_src>
import functools

import jax
import jax.numpy as jnp
from jax.experimental import pallas as pl
from jax.experimental.pallas import tpu as pltpu


def vae_kernel(x_ref, eps_ref,
               w_e1_ref, b_e1_ref,
               w_muv_ref, b_muv_ref,
               w_d1_ref, b_d1_ref,
               w_out_ref, b_out_ref,
               out_ref, *, h2):
    x = x_ref[...]
    eps = eps_ref[...]

    # ---- encoder ----
    h = jnp.dot(x, w_e1_ref[...], preferred_element_type=jnp.float32) + b_e1_ref[...]
    h = jnp.maximum(h, 0.0)                          # ReLU (dropout = identity)

    # fused z_mean / z_log_var head: one MXU push over [H1, H2+H1]
    zmv = jnp.dot(h.astype(w_muv_ref.dtype), w_muv_ref[...],
                  preferred_element_type=jnp.float32) + b_muv_ref[...]
    zm = zmv[:, :h2]                                 # z_mean     [TB, H2]
    zv = zmv[:, h2:]                                 # z_log_var  [TB, H1]

    # ---- reparametrize ----
    z = zm + jnp.exp(zv * 0.5) * eps

    # ---- decoder ----
    d = jnp.dot(z.astype(w_d1_ref.dtype), w_d1_ref[...],
                preferred_element_type=jnp.float32) + b_d1_ref[...]
    d = jnp.maximum(d, 0.0)                          # ReLU (dropout = identity)

    y = jnp.dot(d.astype(w_out_ref.dtype), w_out_ref[...],
                preferred_element_type=jnp.float32) + b_out_ref[...]
    y = jnp.maximum(y, 0.0)                          # final ReLU

    # single lane-dense output slab [TB, D_in + H2 + H1] — one unmasked store.
    out_ref[...] = jnp.concatenate([y, zm, zv], axis=-1).astype(out_ref.dtype)


def _pick_batch_tile(B, batch_tile, row_align):
    """Largest batch tile <= batch_tile that divides B and respects sublane
    packing (multiple of row_align unless it equals the whole batch).  If the
    whole batch fits in one tile, try to split it in two so v7x megacore gets
    both TensorCores busy."""
    if B <= batch_tile:
        half = B // 2
        if half >= row_align and half % row_align == 0 and B % half == 0:
            return half                              # 2 balanced grid steps
        return B                                     # single full-batch tile
    tb = max((batch_tile // row_align) * row_align, row_align)
    while tb > row_align and B % tb != 0:
        tb -= row_align
    if B % tb != 0:
        return B
    return tb


@functools.partial(jax.jit, static_argnames=("batch_tile",))
def vae_forward(x, eps, params, *, batch_tile=4096):
    """Fused VAE forward.  Returns (reconstruction, z_mean, z_log_var).

    Pass bf16 x/eps/params on v6e/v7x for peak throughput (halves HBM traffic
    and hits bf16 MXU peak); all dots accumulate in f32 regardless."""
    B, D_in = x.shape
    H1 = params["w_e1"].shape[1]
    H2 = params["w_mu"].shape[1]
    # The original PyTorch reparametrize only broadcasts correctly when H1==H2.
    assert H1 == H2, "reparametrize broadcast requires hidden_size_1 == hidden_size_2"
    assert eps.shape == (B, H2)

    out_dtype = x.dtype
    itemsize = jnp.dtype(out_dtype).itemsize
    # sublane packing: 8 rows for 32-bit, 16 for 16-bit dtypes, etc.
    row_align = 8 * max(1, 4 // itemsize)

    # ---- fuse the two encoder heads (z_mean | z_log_var) into one weight ----
    w_muv = jnp.concatenate([params["w_mu"], params["w_lv"]], axis=1)   # [H1, H2+H1]
    b_muv = jnp.concatenate([params["b_mu"], params["b_lv"]], axis=1)   # [1,  H2+H1]

    total = D_in + H2 + H1          # 64 + 32 + 32 = 128 → one full lane width

    # ---- batch tiling: stream x/eps/out, keep weights VMEM-resident ----
    tb = _pick_batch_tile(B, batch_tile, row_align)
    grid = (B // tb,)

    # VMEM budget: double-buffered x/eps/out tiles + resident weights + headroom.
    weight_bytes = sum(int(v.size) * jnp.dtype(v.dtype).itemsize
                       for v in params.values())
    tile_bytes = 2 * tb * (D_in + H2 + total) * itemsize
    vmem_limit = int(min(48 << 20, max(16 << 20, tile_bytes + weight_bytes + (4 << 20))))

    # Advisory cost: 4 matmuls + exp, I/O bytes (lets XLA schedule around us).
    flops = 2 * B * (D_in * H1 + H1 * (H2 + H1) + H2 * H1 + H1 * D_in)
    bytes_accessed = (B * (D_in + H2 + total)) * itemsize + weight_bytes
    cost = pl.CostEstimate(flops=flops, transcendentals=B * H1,
                           bytes_accessed=bytes_accessed)

    batch_spec = lambda width: pl.BlockSpec((tb, width), lambda i: (i, 0))
    resident = pl.BlockSpec(memory_space=pltpu.MemorySpace.VMEM)   # untiled, grid-invariant

    out = pl.pallas_call(
        functools.partial(vae_kernel, h2=H2),
        out_shape=jax.ShapeDtypeStruct((B, total), out_dtype),
        grid=grid,
        in_specs=[batch_spec(D_in), batch_spec(H2)] + [resident] * 8,
        out_specs=batch_spec(total),
        compiler_params=pltpu.CompilerParams(
            dimension_semantics=("parallel",),      # megacore: split batch tiles on v7x
            vmem_limit_bytes=vmem_limit),
        cost_estimate=cost,
    )(x, eps,
      params["w_e1"], params["b_e1"],
      w_muv, b_muv,
      params["w_d1"], params["b_d1"],
      params["w_out"], params["b_out"])

    # Slices stay inside this jit, so they fuse into consumers (no extra HBM pass).
    recon = out[:, :D_in]
    z_mean = out[:, D_in:D_in + H2]
    z_log_var = out[:, D_in + H2:]
    return recon, z_mean, z_log_var


def init_params(key, input_size, hidden_1, hidden_2):
    """Deterministic PyTorch-Linear-style init: U(-1/sqrt(fan_in), 1/sqrt(fan_in))."""
    def linear(k, fan_in, fan_out):
        kw, kb = jax.random.split(k)
        bound = 1.0 / jnp.sqrt(fan_in)
        w = jax.random.uniform(kw, (fan_in, fan_out), jnp.float32, -bound, bound)
        b = jax.random.uniform(kb, (1, fan_out), jnp.float32, -bound, bound)
        return w, b

    k1, k2, k3, k4, k5 = jax.random.split(key, 5)
    w_e1, b_e1 = linear(k1, input_size, hidden_1)    # encoder.Dense
    w_mu, b_mu = linear(k2, hidden_1, hidden_2)      # encoder.z_mean
    w_lv, b_lv = linear(k3, hidden_1, hidden_1)      # encoder.z_log_var (H1 out, as in source)
    w_d1, b_d1 = linear(k4, hidden_2, hidden_1)      # decoder.Dense
    w_out, b_out = linear(k5, hidden_1, input_size)  # decoder.out
    return dict(w_e1=w_e1, b_e1=b_e1, w_mu=w_mu, b_mu=b_mu, w_lv=w_lv, b_lv=b_lv,
                w_d1=w_d1, b_d1=b_d1, w_out=w_out, b_out=b_out)


if __name__ == "__main__":
    # config: input_size=64, hidden_size_1=32, hidden_size_2=32 (H1==H2 so the
    # original reparametrize broadcast is valid), batch=8.
    B, INPUT, H1, H2 = 8, 64, 32, 32

    key = jax.random.PRNGKey(0)
    kx, keps, kp = jax.random.split(key, 3)

    x = jax.random.normal(kx, (B, INPUT), jnp.float32)
    eps = jax.random.normal(keps, (B, H2), jnp.float32)   # torch.randn(z_mean.shape)
    params = init_params(kp, INPUT, H1, H2)

    # ---- f32 path: tight reference check ----
    recon, z_mean, z_log_var = vae_forward(x, eps, params)
    jax.block_until_ready((recon, z_mean, z_log_var))

    # pure-JAX reference
    h = jnp.maximum(x @ params["w_e1"] + params["b_e1"], 0.0)
    zm = h @ params["w_mu"] + params["b_mu"]
    zv = h @ params["w_lv"] + params["b_lv"]
    z = zm + jnp.exp(zv * 0.5) * eps
    d = jnp.maximum(z @ params["w_d1"] + params["b_d1"], 0.0)
    y = jnp.maximum(d @ params["w_out"] + params["b_out"], 0.0)
    assert jnp.allclose(recon, y, atol=1e-5), "recon mismatch"
    assert jnp.allclose(z_mean, zm, atol=1e-5), "z_mean mismatch"
    assert jnp.allclose(z_log_var, zv, atol=1e-5), "z_log_var mismatch"

    # ---- bf16 fast path: halved HBM I/O, dots still accumulate in f32 ----
    xb = x.astype(jnp.bfloat16)
    eb = eps.astype(jnp.bfloat16)
    pb = jax.tree_util.tree_map(lambda a: a.astype(jnp.bfloat16), params)
    rb, zmb, zvb = vae_forward(xb, eb, pb)
    jax.block_until_ready((rb, zmb, zvb))
    assert rb.dtype == jnp.bfloat16 and zmb.dtype == jnp.bfloat16
    assert jnp.allclose(rb.astype(jnp.float32), y, atol=0.1, rtol=0.1), "bf16 recon mismatch"
    assert jnp.allclose(zmb.astype(jnp.float32), zm, atol=0.1, rtol=0.1), "bf16 z_mean mismatch"
    assert jnp.allclose(zvb.astype(jnp.float32), zv, atol=0.1, rtol=0.1), "bf16 z_log_var mismatch"

    print("KERNEL_OK")
</pallas_src>

<mosaic_0001>
module attributes {stable_mosaic.version = 11 : i64} {
  func.func @vae_kernel(%arg0: i32, %arg1: memref<8x64xf32, #tpu.memory_space<vmem>>, %arg2: memref<8x32xf32, #tpu.memory_space<vmem>>, %arg3: memref<64x32xf32, #tpu.memory_space<vmem>>, %arg4: memref<1x32xf32, #tpu.memory_space<vmem>>, %arg5: memref<32x64xf32, #tpu.memory_space<vmem>>, %arg6: memref<1x64xf32, #tpu.memory_space<vmem>>, %arg7: memref<32x32xf32, #tpu.memory_space<vmem>>, %arg8: memref<1x32xf32, #tpu.memory_space<vmem>>, %arg9: memref<32x64xf32, #tpu.memory_space<vmem>>, %arg10: memref<1x64xf32, #tpu.memory_space<vmem>>, %arg11: memref<8x128xf32, #tpu.memory_space<vmem>>) attributes {dimension_semantics = [#tpu.dimension_semantics<parallel>], iteration_bounds = array<i64: 1>, scalar_prefetch = 0 : i64, scratch_operands = 0 : i64, tpu.core_type = #tpu.core_type<tc>, window_params = [{transform_indices = @transform_0, window_bounds = array<i64: 8, 64>}, {transform_indices = @transform_1, window_bounds = array<i64: 8, 32>}, {pipeline_mode = #tpu.pipeline_mode<synchronous>, transform_indices = @transform_2, window_bounds = array<i64: 64, 32>}, {pipeline_mode = #tpu.pipeline_mode<synchronous>, transform_indices = @transform_3, window_bounds = array<i64: 1, 32>}, {pipeline_mode = #tpu.pipeline_mode<synchronous>, transform_indices = @transform_4, window_bounds = array<i64: 32, 64>}, {pipeline_mode = #tpu.pipeline_mode<synchronous>, transform_indices = @transform_5, window_bounds = array<i64: 1, 64>}, {pipeline_mode = #tpu.pipeline_mode<synchronous>, transform_indices = @transform_6, window_bounds = array<i64: 32, 32>}, {pipeline_mode = #tpu.pipeline_mode<synchronous>, transform_indices = @transform_7, window_bounds = array<i64: 1, 32>}, {pipeline_mode = #tpu.pipeline_mode<synchronous>, transform_indices = @transform_8, window_bounds = array<i64: 32, 64>}, {pipeline_mode = #tpu.pipeline_mode<synchronous>, transform_indices = @transform_9, window_bounds = array<i64: 1, 64>}, {transform_indices = @transform_10, window_bounds = array<i64: 8, 128>}]} {
    %c0 = arith.constant 0 : index
    %c0_0 = arith.constant 0 : index
    %0 = vector.load %arg1[%c0, %c0_0] : memref<8x64xf32, #tpu.memory_space<vmem>>, vector<8x64xf32>
    %c0_1 = arith.constant 0 : index
    %c0_2 = arith.constant 0 : index
    %1 = vector.load %arg2[%c0_1, %c0_2] : memref<8x32xf32, #tpu.memory_space<vmem>>, vector<8x32xf32>
    %c0_3 = arith.constant 0 : index
    %c0_4 = arith.constant 0 : index
    %2 = vector.load %arg3[%c0_3, %c0_4] : memref<64x32xf32, #tpu.memory_space<vmem>>, vector<64x32xf32>
    %cst = arith.constant dense<0.000000e+00> : vector<8x32xf32>
    %3 = tpu.matmul %0, %2, %cst {dimension_numbers = #tpu.dot_dimension_numbers<[1], [0], [0], [1], [0, 0, 1, 1], [], []>} : vector<8x64xf32>, vector<64x32xf32>, vector<8x32xf32> -> vector<8x32xf32>
    %c0_5 = arith.constant 0 : index
    %c0_6 = arith.constant 0 : index
    %4 = vector.load %arg4[%c0_5, %c0_6] : memref<1x32xf32, #tpu.memory_space<vmem>>, vector<1x32xf32>
    %5 = vector.broadcast %4 : vector<1x32xf32> to vector<8x32xf32>
    %6 = arith.addf %3, %5 : vector<8x32xf32>
    %cst_7 = arith.constant 0.000000e+00 : f32
    %7 = vector.broadcast %cst_7 : f32 to vector<8x32xf32>
    %8 = arith.maximumf %6, %7 : vector<8x32xf32>
    %c0_8 = arith.constant 0 : index
    %c0_9 = arith.constant 0 : index
    %9 = vector.load %arg5[%c0_8, %c0_9] : memref<32x64xf32, #tpu.memory_space<vmem>>, vector<32x64xf32>
    %cst_10 = arith.constant dense<0.000000e+00> : vector<8x64xf32>
    %10 = tpu.matmul %8, %9, %cst_10 {dimension_numbers = #tpu.dot_dimension_numbers<[1], [0], [0], [1], [0, 0, 1, 1], [], []>} : vector<8x32xf32>, vector<32x64xf32>, vector<8x64xf32> -> vector<8x64xf32>
    %c0_11 = arith.constant 0 : index
    %c0_12 = arith.constant 0 : index
    %11 = vector.load %arg6[%c0_11, %c0_12] : memref<1x64xf32, #tpu.memory_space<vmem>>, vector<1x64xf32>
    %12 = vector.broadcast %11 : vector<1x64xf32> to vector<8x64xf32>
    %13 = arith.addf %10, %12 : vector<8x64xf32>
    %14 = vector.extract_strided_slice %13 {offsets = [0, 0], sizes = [8, 32], strides = [1, 1]} : vector<8x64xf32> to vector<8x32xf32>
    %15 = vector.extract_strided_slice %13 {offsets = [0, 32], sizes = [8, 32], strides = [1, 1]} : vector<8x64xf32> to vector<8x32xf32>
    %cst_13 = arith.constant 5.000000e-01 : f32
    %16 = vector.broadcast %cst_13 : f32 to vector<8x32xf32>
    %17 = arith.mulf %15, %16 : vector<8x32xf32>
    %18 = math.exp %17 : vector<8x32xf32>
    %19 = arith.mulf %18, %1 : vector<8x32xf32>
    %20 = arith.addf %14, %19 : vector<8x32xf32>
    %c0_14 = arith.constant 0 : index
    %c0_15 = arith.constant 0 : index
    %21 = vector.load %arg7[%c0_14, %c0_15] : memref<32x32xf32, #tpu.memory_space<vmem>>, vector<32x32xf32>
    %cst_16 = arith.constant dense<0.000000e+00> : vector<8x32xf32>
    %22 = tpu.matmul %20, %21, %cst_16 {dimension_numbers = #tpu.dot_dimension_numbers<[1], [0], [0], [1], [0, 0, 1, 1], [], []>} : vector<8x32xf32>, vector<32x32xf32>, vector<8x32xf32> -> vector<8x32xf32>
    %c0_17 = arith.constant 0 : index
    %c0_18 = arith.constant 0 : index
    %23 = vector.load %arg8[%c0_17, %c0_18] : memref<1x32xf32, #tpu.memory_space<vmem>>, vector<1x32xf32>
    %24 = vector.broadcast %23 : vector<1x32xf32> to vector<8x32xf32>
    %25 = arith.addf %22, %24 : vector<8x32xf32>
    %cst_19 = arith.constant 0.000000e+00 : f32
    %26 = vector.broadcast %cst_19 : f32 to vector<8x32xf32>
    %27 = arith.maximumf %25, %26 : vector<8x32xf32>
    %c0_20 = arith.constant 0 : index
    %c0_21 = arith.constant 0 : index
    %28 = vector.load %arg9[%c0_20, %c0_21] : memref<32x64xf32, #tpu.memory_space<vmem>>, vector<32x64xf32>
    %cst_22 = arith.constant dense<0.000000e+00> : vector<8x64xf32>
    %29 = tpu.matmul %27, %28, %cst_22 {dimension_numbers = #tpu.dot_dimension_numbers<[1], [0], [0], [1], [0, 0, 1, 1], [], []>} : vector<8x32xf32>, vector<32x64xf32>, vector<8x64xf32> -> vector<8x64xf32>
    %c0_23 = arith.constant 0 : index
    %c0_24 = arith.constant 0 : index
    %30 = vector.load %arg10[%c0_23, %c0_24] : memref<1x64xf32, #tpu.memory_space<vmem>>, vector<1x64xf32>
    %31 = vector.broadcast %30 : vector<1x64xf32> to vector<8x64xf32>
    %32 = arith.addf %29, %31 : vector<8x64xf32>
    %cst_25 = arith.constant 0.000000e+00 : f32
    %33 = vector.broadcast %cst_25 : f32 to vector<8x64xf32>
    %34 = arith.maximumf %32, %33 : vector<8x64xf32>
    %35 = tpu.concatenate %34, %14, %15 in 1 : vector<8x64xf32>, vector<8x32xf32>, vector<8x32xf32> -> vector<8x128xf32>
    %c0_26 = arith.constant 0 : index
    %c0_27 = arith.constant 0 : index
    %36 = vector.load %arg11[%c0_26, %c0_27] : memref<8x128xf32, #tpu.memory_space<vmem>>, vector<8x128xf32>
    tpu.vector_store %arg11[%c0_26, %c0_27], %35 {strides = array<i32>} : memref<8x128xf32, #tpu.memory_space<vmem>>, vector<8x128xf32>,
    return
  }
  func.func @transform_0(%arg0: i32) -> (i32, i32) {
    %c0_i32 = arith.constant 0 : i32
    %c0_i32_0 = arith.constant 0 : i32
    return %arg0, %c0_i32 : i32, i32
  }
  func.func @transform_1(%arg0: i32) -> (i32, i32) {
    %c0_i32 = arith.constant 0 : i32
    %c0_i32_0 = arith.constant 0 : i32
    return %arg0, %c0_i32 : i32, i32
  }
  func.func @transform_2(%arg0: i32) -> (i32, i32) {
    %c0_i32 = arith.constant 0 : i32
    %c0_i32_0 = arith.constant 0 : i32
    %c0_i32_1 = arith.constant 0 : i32
    return %c0_i32, %c0_i32_0 : i32, i32
  }
  func.func @transform_3(%arg0: i32) -> (i32, i32) {
    %c0_i32 = arith.constant 0 : i32
    %c0_i32_0 = arith.constant 0 : i32
    %c0_i32_1 = arith.constant 0 : i32
    return %c0_i32, %c0_i32_0 : i32, i32
  }
  func.func @transform_4(%arg0: i32) -> (i32, i32) {
    %c0_i32 = arith.constant 0 : i32
    %c0_i32_0 = arith.constant 0 : i32
    %c0_i32_1 = arith.constant 0 : i32
    return %c0_i32, %c0_i32_0 : i32, i32
  }
  func.func @transform_5(%arg0: i32) -> (i32, i32) {
    %c0_i32 = arith.constant 0 : i32
    %c0_i32_0 = arith.constant 0 : i32
    %c0_i32_1 = arith.constant 0 : i32
    return %c0_i32, %c0_i32_0 : i32, i32
  }
  func.func @transform_6(%arg0: i32) -> (i32, i32) {
    %c0_i32 = arith.constant 0 : i32
    %c0_i32_0 = arith.constant 0 : i32
    %c0_i32_1 = arith.constant 0 : i32
    return %c0_i32, %c0_i32_0 : i32, i32
  }
  func.func @transform_7(%arg0: i32) -> (i32, i32) {
    %c0_i32 = arith.constant 0 : i32
    %c0_i32_0 = arith.constant 0 : i32
    %c0_i32_1 = arith.constant 0 : i32
    return %c0_i32, %c0_i32_0 : i32, i32
  }
  func.func @transform_8(%arg0: i32) -> (i32, i32) {
    %c0_i32 = arith.constant 0 : i32
    %c0_i32_0 = arith.constant 0 : i32
    %c0_i32_1 = arith.constant 0 : i32
    return %c0_i32, %c0_i32_0 : i32, i32
  }
  func.func @transform_9(%arg0: i32) -> (i32, i32) {
    %c0_i32 = arith.constant 0 : i32
    %c0_i32_0 = arith.constant 0 : i32
    %c0_i32_1 = arith.constant 0 : i32
    return %c0_i32, %c0_i32_0 : i32, i32
  }
  func.func @transform_10(%arg0: i32) -> (i32, i32) {
    %c0_i32 = arith.constant 0 : i32
    %c0_i32_0 = arith.constant 0 : i32
    return %arg0, %c0_i32 : i32, i32
  }
}

</mosaic_0001>

<bundles_post_ra>
// kernel: vae_forward.1
= control target key start
LH: loop header
LB: loop body
LE: loop exit
PB: predicated region body
PF: predicated region fallthrough
CT: control target
= control target key end

     0   :  { %vm49_vm0 = vcmask 523264   ;;  %s208_s19 = smov 32   ;;  %vm82_vm1 = vcmask 261120   ;;  %vm188_vm2 = vcmask 785408   ;;  %s352_s2 = inlined_call_operand.vmem [shape: f32[64,32], index: 2, kind: input, shape index: {}]   ;;  %s353_s4 = inlined_call_operand.vmem [shape: f32[32,64], index: 4, kind: input, shape index: {}]   ;;  %s354_s3 = inlined_call_operand.vmem [shape: f32[1,32], index: 3, kind: input, shape index: {}]   ;;  %s355_s0 = inlined_call_operand.vmem [shape: f32[8,64], index: 0, kind: input, shape index: {}]   ;;  %s356_s5 = inlined_call_operand.vmem [shape: f32[1,64], index: 5, kind: input, shape index: {}]   ;;  %s357_s1 = inlined_call_operand.vmem [shape: f32[8,32], index: 1, kind: input, shape index: {}]   ;;  %s358_s7 = inlined_call_operand.vmem [shape: f32[1,32], index: 7, kind: input, shape index: {}]   ;;  %s359_s6 = inlined_call_operand.vmem [shape: f32[32,32], index: 6, kind: input, shape index: {}]   ;;  %s360_s8 = inlined_call_operand.vmem [shape: f32[32,64], index: 8, kind: input, shape index: {}]   ;;  %s361_s9 = inlined_call_operand.vmem [shape: f32[1,64], index: 9, kind: input, shape index: {}]   ;;  %s362_s10 = inlined_call_operand.vmem [shape: f32[8,128], index: 10, kind: output, shape index: {}]  }
   0x1   :  { %v44_v0 = vld [vmem:[%s352_s2 + $0x38] sm:$0xff]  ;;  %v43_v1 = vld [vmem:[%s352_s2 + $0x30] sm:$0xff]  ;;  %v42_v2 = vld [vmem:[%s352_s2 + $0x28] sm:$0xff] }
   0x2   :  { %61 = vmatpush.msra.mxu0 %v44_v0  ;;  %v77_v3 = vld [vmem:[%s353_s4 + $0x18] sm:$0xff]  ;;  %v41_v4 = vld [vmem:[%s352_s2 + $0x20] sm:$0xff]  ;;  %v39_v6 = vld [vmem:[%s352_s2 + $0x10] sm:$0xff] }
   0x3   :  { %98 = vmatpush.msra.mxu1 %v77_v3  ;;  %v40_v5 = vld [vmem:[%s352_s2 + $0x18] sm:$0xff]  ;;  %v38_v7 = vld [vmem:[%s352_s2 + $0x8] sm:$0xff]  ;;  %v37_v8 = vld [vmem:[%s352_s2] sm:$0xff] }
   0x4   :  { %62 = vmatpush.msra.mxu0 %v43_v1  ;;  %v35_v9 = vld [vmem:[%s355_s0] sm:$0xff]  ;;  %v76_v10 = vld [vmem:[%s353_s4 + $0x10] sm:$0xff]  ;;  %v75_v11 = vld [vmem:[%s353_s4 + $0x8] sm:$0xff] }
   0x5   :  { %99 = vmatpush.msra.mxu1 %v76_v10  ;;  %v74_v12 = vld [vmem:[%s353_s4] sm:$0xff]  ;;  %v122_v26 = vld [vmem:[%s359_s6 + $0x18] sm:$0xff]  ;;  %v121_v27 = vld [vmem:[%s359_s6 + $0x10] sm:$0xff] }
   0x6   :  { %63 = vmatpush.msra.mxu0 %v42_v2  ;;  %v36_v13 = vld [vmem:[%s357_s1] sm:$0xff]  ;;  %s209_s1 = smov 64   ;;  %142 = vmatpush.msra.mxu2 %v122_v26  ;;  %v120_v28 = vld [vmem:[%s359_s6 + $0x8] sm:$0xff]  ;;  %v154_v30 = vld [vmem:[%s360_s8 + $0x18] sm:$0xff] }
   0x7   :  { %100 = vmatpush.msra.mxu1 %v75_v11  ;;  %110 = vrot.lane.b32.xlu0 %v36_v13, %s208_s19  ;;  %v202_v14 = vld [vmem:[%s354_s3] ss:$0 sm:$0xff]  ;;  %s210_s3 = smov 96   ;;  %v153_v33 = vld [vmem:[%s360_s8 + $0x10] sm:$0xff]  ;;  %v152_v34 = vld [vmem:[%s360_s8 + $0x8] sm:$0xff] }
   0x8   :  { %64 = vmatpush.msra.mxu0 %v41_v4  ;;  %v203_v18 = vld [vmem:[%s356_s5] ss:$0 sm:$0xff]  ;;  %143 = vmatpush.msra.mxu2 %v121_v27 }
   0x9   :  { %101 = vmatpush.msra.mxu1 %v74_v12  ;;  %v119_v29 = vld [vmem:[%s359_s6] sm:$0xff]  ;;  %174 = vmatpush.msra.mxu3 %v154_v30 }
   0xa   :  { %65 = vmatpush.msra.mxu0 %v40_v5  ;;  %144 = vmatpush.msra.mxu2 %v120_v28  ;;  %v151_v35 = vld [vmem:[%s360_s8] sm:$0xff] }
   0xb   :  { %175 = vmatpush.msra.mxu3 %v153_v33  ;;  %v204_v36 = vld [vmem:[%s358_s7] ss:$0 sm:$0xff] }
   0xc   :  { %66 = vmatpush.msra.mxu0 %v39_v6  ;;  %145 = vmatpush.msra.mxu2 %v119_v29  ;;  %v205_v40 = vld [vmem:[%s361_s9] ss:$0 sm:$0xff] }
   0xd   :  { %176 = vmatpush.msra.mxu3 %v152_v34 }
   0xe   :  { %67 = vmatpush.msra.mxu0 %v38_v7 }
   0xf   :  { %177 = vmatpush.msra.mxu3 %v151_v35 }
  0x10   :  { %68 = vmatpush.msra.mxu0 %v37_v8 }
  0x11   :  { %195 = vmatmul.msk.f32.vlgmr.msra.gmra.mxu0 %vm49_vm0, %v35_v9 }
  0x79   :  { %v111_v23 = vpop.permute.xlu0 %110 }
  0x8e   :  { %v70_v15 = vpop.f32.mrf.mxu0 }
  0x8f   :  { %v71_v16 = vadd.f32 %v202_v14, %v70_v15 }
  0x91   :  { %v73_v17 = vmax.f32 %v71_v16, 0.0 }
  0x93   :  { %196 = vmatmul.msk.f32.vlgmr.msra.gmra.mxu1 %vm82_vm1, %v73_v17 }
 0x110   :  { %v103_v19 = vpop.f32.mrf.mxu1 }
 0x111   :  { %v104_v20 = vadd.f32 %v203_v18, %v103_v19 }
 0x113   :  { %v106_v21 = vmul.f32 0.5, %v104_v20  ;;  %184 = vrot.lane.b32.xlu1 %v104_v20, %s209_s1 }
 0x115   :  { %v107_v22 = vmul.f32 1.442695, %v106_v21 }
 0x117   :  { %206 = vpow2.f32 %v107_v22 }
 0x11d   :  { %v207_v24 = vpop.eup %206 }
 0x11e   :  { %v113_v25 = vmul.f32 %v207_v24, %v111_v23 }
 0x120   :  { %115 = vrot.lane.b32.xlu0 %v113_v25, %s210_s3 }
 0x185   :  { %v185_v44 = vpop.permute.xlu1 %184 }
 0x192   :  { %v116_v31 = vpop.permute.xlu0 %115 }
 0x193   :  { %v118_v32 = vadd.f32 %v116_v31, %v104_v20 }
 0x195   :  { %197 = vmatmul.msk.f32.vlgmr.msra.gmra.mxu2 %vm82_vm1, %v118_v32 }
 0x218   :  { %v147_v37 = vpop.f32.mrf.mxu2 }
 0x219   :  { %v148_v38 = vadd.f32 %v204_v36, %v147_v37 }
 0x21b   :  { %v150_v39 = vmax.f32 %v148_v38, 0.0 }
 0x21d   :  { %198 = vmatmul.msk.f32.vlgmr.msra.gmra.mxu3 %vm82_vm1, %v150_v39 }
 0x2a0   :  { %v179_v41 = vpop.f32.mrf.mxu3 }
 0x2a1   :  { %v180_v42 = vadd.f32 %v205_v40, %v179_v41 }
 0x2a3   :  { %v182_v43 = vmax.f32 %v180_v42, 0.0 }
 0x2a5   :  { %v187_v45 = vsel %vm49_vm0, %v182_v43, %v185_v44 }
 0x2a6   :  { %v189_v46 = vsel %vm188_vm2, %v187_v45, %v185_v44 }
 0x2a7   :  { %190 = vst [vmem:[%s362_s10] sm:$0xff] %v189_v46 }

</bundles_post_ra>
